<compile_context>
chip_gen: v5e
topology: v5e:2x2
jax: 0.10.0
libtpu: 0.0.40
codegen_flags: <defaults>
</compile_context>

<pallas_src>
import math
import numbers

import numpy as np
import jax
import jax.numpy as jnp
from jax.experimental import pallas as pl
from jax.experimental.pallas import tpu as pltpu


# -------------------------------------------------------------------------
# Padding helper (same semantics / same quirk as the PyTorch helper:
# width padding checks kernel_size[0] parity, height checks kernel_size[1]).
# F.pad order: (left, right, top, bottom).
# -------------------------------------------------------------------------
def compute_padding(kernel_size):
    assert len(kernel_size) == 2, kernel_size
    computed = [k // 2 for k in kernel_size]
    return [
        computed[1] - 1 if kernel_size[0] % 2 == 0 else computed[1],
        computed[1],
        computed[0] - 1 if kernel_size[1] % 2 == 0 else computed[0],
        computed[0],
    ]


# -------------------------------------------------------------------------
# Trace-time (numpy) construction of the separable Gaussian weights and the
# reflect-padded "valid correlation" banded (Toeplitz) matrices.
# -------------------------------------------------------------------------
def _gaussian_1d(size, std):
    x = np.arange(size, dtype=np.float32)
    mean = (size - 1) / 2.0
    g = (1.0 / (std * math.sqrt(2.0 * math.pi))) * np.exp(
        -(((x - mean) / std) ** 2) / 2.0
    )
    # Normalising each 1D factor gives exactly the torch-normalised 2D kernel
    # as their outer product.
    return (g / g.sum()).astype(np.float32)


def _reflect_index(i, n):
    if i < 0:
        return -i
    if i >= n:
        return 2 * (n - 1) - i
    return i


def _reflect_toeplitz(g, n_in, n_out, pad_before):
    """T[src, dst] such that out[dst] = sum_src x[src] * T[src, dst]
    reproduces reflect padding followed by a valid 1D correlation with g.
    NOTE: requires pad_before < n_in (same restriction as reflect padding)."""
    k = int(g.shape[0])
    assert pad_before < n_in, "reflect padding requires pad < size"
    assert (n_out - 1) + (k - 1) - pad_before <= 2 * (n_in - 1), "pad too large"
    t = np.zeros((n_in, n_out), dtype=np.float32)
    for dst in range(n_out):
        for kk in range(k):
            src = _reflect_index(dst + kk - pad_before, n_in)
            t[src, dst] += g[kk]
    return t


# -------------------------------------------------------------------------
# VMEM budgeting helpers.
# -------------------------------------------------------------------------
def _vmem_capacity_bytes():
    try:
        return int(pltpu.get_tpu_info().vmem_capacity_bytes)
    except Exception:
        return 64 << 20  # conservative: v7x per-TensorCore capacity


def _vmem_limit(needed_bytes, capacity):
    # Enough for our footprint (+ headroom), never more than capacity minus a
    # safety margin (so we never request more scoped VMEM than exists).
    limit = max(needed_bytes + (4 << 20), 16 << 20)
    return int(min(limit, capacity - (8 << 20)))


def _pick_kron_block(nc, per_img_bytes, fixed_bytes, capacity):
    """Largest tile-aligned divisor of `nc` that fits ~35% of VMEM.

    Review guidance: ~40-48 MiB working set on 128 MiB parts (v5e/v6e),
    ~20-24 MiB on v7x (64 MiB); keep >=4 grid steps when there is enough work
    so both v7x TensorCores get pipelined steps."""
    budget = max(per_img_bytes, int(0.35 * capacity) - fixed_bytes)
    bmax = max(1, budget // per_img_bytes)
    min_steps = 4 if nc >= 32 else 1
    divisors = [b for b in range(1, nc + 1) if nc % b == 0]
    # Second-minor block dim must be a multiple of 8 (f32 sublane tile) or the
    # full extent, so loads/stores stay unmasked.
    aligned = [b for b in divisors if (b % 8 == 0 or b == nc) and b <= bmax]
    best = None
    for b in aligned:
        if nc // b >= min_steps:
            best = b if best is None else max(best, b)
    if best is None and aligned:
        best = max(aligned)
    if best is None:
        best = max(b for b in divisors if b <= bmax)
    return best


# -------------------------------------------------------------------------
# Pallas kernels.
# -------------------------------------------------------------------------
def _kron_blur_kernel(m_ref, x_ref, o_ref):
    # m_ref: (H*W, Ho*Wo) full reflect-padded 2D blur matrix (constant block)
    # x_ref: (B, H*W) flattened images, o_ref: (B, Ho*Wo)
    o_ref[...] = jax.lax.dot_general(
        x_ref[...], m_ref[...],
        dimension_numbers=(((1,), (0,)), ((), ())),
        precision=jax.lax.Precision.HIGHEST,
        preferred_element_type=jnp.float32,
    ).astype(o_ref.dtype)


def _separable_blur_kernel(th_ref, tw_ref, x_ref, o_ref):
    # th_ref: (H, Ho) vertical reflect-Toeplitz, tw_ref: (W, Wo) horizontal,
    # x_ref: (H, W) one image, o_ref: (Ho, Wo).
    # Horizontal pass: contract W (lane axis) on the MXU.
    t = jax.lax.dot_general(
        x_ref[...], tw_ref[...],
        dimension_numbers=(((1,), (0,)), ((), ())),
        precision=jax.lax.Precision.HIGHEST,
        preferred_element_type=jnp.float32,
    )  # (H, Wo)
    # Vertical pass: transposed-LHS contraction over H; no broadcast, no
    # batched tiny matmuls, weights pushed once per image.
    o_ref[...] = jax.lax.dot_general(
        th_ref[...], t,
        dimension_numbers=(((0,), (0,)), ((), ())),
        precision=jax.lax.Precision.HIGHEST,
        preferred_element_type=jnp.float32,
    ).astype(o_ref.dtype)


# -------------------------------------------------------------------------
# Wrappers.
# -------------------------------------------------------------------------
def _blur_small_kron(xf, th_sd, tw, H, W, Ho, Wo, capacity):
    """Small-image path: one lane-dense matmul per block of flattened images."""
    NC = xf.shape[0]
    HW, HoWo = H * W, Ho * Wo
    m = jnp.asarray(np.kron(th_sd, tw))      # (H*W, Ho*Wo)
    x2 = xf.reshape(NC, HW)                  # free view: (h, w) -> h*W + w

    fixed = 2 * 4 * HW * HoWo                # double-buffered blur matrix
    per_img = 2 * 4 * (HW + HoWo) + 4 * HoWo  # dbl-buffered in/out + dot result
    B = _pick_kron_block(NC, per_img, fixed, capacity)
    needed = fixed + B * per_img

    out2 = pl.pallas_call(
        _kron_blur_kernel,
        out_shape=jax.ShapeDtypeStruct((NC, HoWo), xf.dtype),
        grid=(NC // B,),
        in_specs=[
            pl.BlockSpec((HW, HoWo), lambda i: (0, 0)),   # blur matrix (const)
            pl.BlockSpec((B, HW), lambda i: (i, 0)),      # image block
        ],
        out_specs=pl.BlockSpec((B, HoWo), lambda i: (i, 0)),
        compiler_params=pltpu.CompilerParams(
            dimension_semantics=("parallel",),
            vmem_limit_bytes=_vmem_limit(needed, capacity)),
    )(m, x2)
    return out2.reshape(NC, Ho, Wo)


def _blur_separable(xf, th_sd, tw, H, W, Ho, Wo, capacity):
    """Large-image path: separable blur, one image per grid step, 2D dots only."""
    NC = xf.shape[0]
    thj = jnp.asarray(th_sd)   # (H, Ho)
    twj = jnp.asarray(tw)      # (W, Wo)
    needed = (2 * 4 * (H * W + Ho * Wo)       # dbl-buffered image in / out
              + 2 * 4 * (H * Ho + W * Wo)     # dbl-buffered Toeplitz matrices
              + 4 * (H * Wo + Ho * Wo))       # in-kernel intermediates
    # TODO(synk): band the Toeplitz contraction (128-256 output-column chunks)
    # for very large H/W so v5e does not flip MXU-bound and VMEM stays bounded.
    out = pl.pallas_call(
        _separable_blur_kernel,
        out_shape=jax.ShapeDtypeStruct((NC, Ho, Wo), xf.dtype),
        grid=(NC,),
        in_specs=[
            pl.BlockSpec((H, Ho), lambda i: (0, 0)),        # vertical matrix
            pl.BlockSpec((W, Wo), lambda i: (0, 0)),        # horizontal matrix
            pl.BlockSpec((None, H, W), lambda i: (i, 0, 0)),  # one image
        ],
        out_specs=pl.BlockSpec((None, Ho, Wo), lambda i: (i, 0, 0)),
        compiler_params=pltpu.CompilerParams(
            dimension_semantics=("parallel",),
            vmem_limit_bytes=_vmem_limit(needed, capacity)),
    )(thj, twj, xf)
    return out


def gaussian_smoothing(x, kernel_size, sigma, dim=2):
    """x: (N, C, H, W) float32 -> reflect-padded depthwise Gaussian blur."""
    # TODO(synk): dim=1 / dim=3 variants of the module are not implemented.
    assert dim == 2, "only the 2D case is implemented"
    if isinstance(kernel_size, numbers.Number):
        kernel_size = [kernel_size] * dim
    if isinstance(sigma, numbers.Number):
        sigma = [sigma] * dim
    KH, KW = int(kernel_size[0]), int(kernel_size[1])
    N, C, H, W = x.shape

    left, right, top, bottom = compute_padding((KH, KW))
    Ho = H + top + bottom - KH + 1   # == H for odd kernels
    Wo = W + left + right - KW + 1   # == W for odd kernels

    gh = _gaussian_1d(KH, float(sigma[0]))
    gw = _gaussian_1d(KW, float(sigma[1]))
    tw = _reflect_toeplitz(gw, W, Wo, left)     # (W, Wo)
    th_sd = _reflect_toeplitz(gh, H, Ho, top)   # (H, Ho)

    NC = N * C
    xf = x.reshape(NC, H, W)                    # free view
    capacity = _vmem_capacity_bytes()

    kron_bytes = 4 * H * W * Ho * Wo
    if kron_bytes <= (4 << 20):
        out = _blur_small_kron(xf, th_sd, tw, H, W, Ho, Wo, capacity)
    else:
        out = _blur_separable(xf, th_sd, tw, H, W, Ho, Wo, capacity)
    return out.reshape(N, C, Ho, Wo)


# -------------------------------------------------------------------------
# Reference (plain JAX / XLA), built exactly like the PyTorch module.
# -------------------------------------------------------------------------
def gaussian_kernel_2d(kernel_size, sigma, dim=2):
    if isinstance(kernel_size, numbers.Number):
        kernel_size = [kernel_size] * dim
    if isinstance(sigma, numbers.Number):
        sigma = [sigma] * dim
    grids = jnp.meshgrid(
        *[jnp.arange(size, dtype=jnp.float32) for size in kernel_size],
        indexing="ij",
    )
    kernel = jnp.ones((), dtype=jnp.float32)
    for size, std, m_grid in zip(kernel_size, sigma, grids):
        mean = (size - 1) / 2
        kernel = kernel * (
            1.0 / (std * math.sqrt(2 * math.pi))
            * jnp.exp(-(((m_grid - mean) / std) ** 2) / 2)
        )
    kernel = kernel / jnp.sum(kernel)
    return kernel.astype(jnp.float32)


def gaussian_smoothing_ref(x, kernel_2d):
    N, C, H, W = x.shape
    KH, KW = kernel_2d.shape
    left, right, top, bottom = compute_padding((KH, KW))
    xp = jnp.pad(
        x, ((0, 0), (0, 0), (top, bottom), (left, right)), mode="reflect"
    )
    w = jnp.broadcast_to(kernel_2d[None, None], (C, 1, KH, KW))
    return jax.lax.conv_general_dilated(
        xp, w, window_strides=(1, 1), padding="VALID",
        dimension_numbers=("NCHW", "OIHW", "NCHW"),
        feature_group_count=C,
        precision=jax.lax.Precision.HIGHEST,
    )


if __name__ == "__main__":
    # Module config: channels=4, kernel_size=5, sigma=1.5, dim=2
    channels, kernel_size, sigma = 4, 5, 1.5
    key = jax.random.PRNGKey(0)
    kernel_2d = gaussian_kernel_2d(kernel_size, sigma, dim=2)

    # Case 1: small images -> fused single-matmul (kron) path.
    x1 = jax.random.normal(key, (2, channels, 16, 16), dtype=jnp.float32)
    out1 = jax.block_until_ready(gaussian_smoothing(x1, kernel_size, sigma))
    ref1 = jax.block_until_ready(gaussian_smoothing_ref(x1, kernel_2d))
    assert out1.shape == (2, channels, 16, 16), out1.shape
    assert jnp.allclose(out1, ref1, atol=1e-5, rtol=1e-5), (
        float(jnp.max(jnp.abs(out1 - ref1)))
    )

    # Case 2: larger images -> separable two-matmul path.
    x2 = jax.random.normal(
        jax.random.fold_in(key, 1), (2, channels, 40, 48), dtype=jnp.float32
    )
    out2 = jax.block_until_ready(gaussian_smoothing(x2, kernel_size, sigma))
    ref2 = jax.block_until_ready(gaussian_smoothing_ref(x2, kernel_2d))
    assert out2.shape == (2, channels, 40, 48), out2.shape
    assert jnp.allclose(out2, ref2, atol=1e-5, rtol=1e-5), (
        float(jnp.max(jnp.abs(out2 - ref2)))
    )

    print("KERNEL_OK")
</pallas_src>

<mosaic_0001>
module attributes {stable_mosaic.version = 11 : i64} {
  func.func @_kron_blur_kernel(%arg0: i32, %arg1: memref<256x256xf32, #tpu.memory_space<vmem>>, %arg2: memref<8x256xf32, #tpu.memory_space<vmem>>, %arg3: memref<8x256xf32, #tpu.memory_space<vmem>>) attributes {dimension_semantics = [#tpu.dimension_semantics<parallel>], iteration_bounds = array<i64: 1>, scalar_prefetch = 0 : i64, scratch_operands = 0 : i64, tpu.core_type = #tpu.core_type<tc>, window_params = [{pipeline_mode = #tpu.pipeline_mode<synchronous>, transform_indices = @transform_0, window_bounds = array<i64: 256, 256>}, {transform_indices = @transform_1, window_bounds = array<i64: 8, 256>}, {transform_indices = @transform_2, window_bounds = array<i64: 8, 256>}]} {
    %c0 = arith.constant 0 : index
    %c0_0 = arith.constant 0 : index
    %0 = vector.load %arg2[%c0, %c0_0] : memref<8x256xf32, #tpu.memory_space<vmem>>, vector<8x256xf32>
    %c0_1 = arith.constant 0 : index
    %c0_2 = arith.constant 0 : index
    %1 = vector.load %arg1[%c0_1, %c0_2] : memref<256x256xf32, #tpu.memory_space<vmem>>, vector<256x256xf32>
    %cst = arith.constant dense<0.000000e+00> : vector<8x256xf32>
    %2 = tpu.matmul %0, %1, %cst {dimension_numbers = #tpu.dot_dimension_numbers<[1], [0], [0], [1], [0, 0, 1, 1], [], []>, precision = #tpu.contract_precision<fp32>} : vector<8x256xf32>, vector<256x256xf32>, vector<8x256xf32> -> vector<8x256xf32>
    %c0_3 = arith.constant 0 : index
    %c0_4 = arith.constant 0 : index
    %3 = vector.load %arg3[%c0_3, %c0_4] : memref<8x256xf32, #tpu.memory_space<vmem>>, vector<8x256xf32>
    tpu.vector_store %arg3[%c0_3, %c0_4], %2 {strides = array<i32>} : memref<8x256xf32, #tpu.memory_space<vmem>>, vector<8x256xf32>,
    return
  }
  func.func @transform_0(%arg0: i32) -> (i32, i32) {
    %c0_i32 = arith.constant 0 : i32
    %c0_i32_0 = arith.constant 0 : i32
    %c0_i32_1 = arith.constant 0 : i32
    return %c0_i32, %c0_i32_0 : i32, i32
  }
  func.func @transform_1(%arg0: i32) -> (i32, i32) {
    %c0_i32 = arith.constant 0 : i32
    %c0_i32_0 = arith.constant 0 : i32
    return %arg0, %c0_i32 : i32, i32
  }
  func.func @transform_2(%arg0: i32) -> (i32, i32) {
    %c0_i32 = arith.constant 0 : i32
    %c0_i32_0 = arith.constant 0 : i32
    return %arg0, %c0_i32 : i32, i32
  }
}

</mosaic_0001>

<bundles_post_ra>
// kernel: tpu_custom_call.1
= control target key start
LH: loop header
LB: loop body
LE: loop exit
PB: predicated region body
PF: predicated region fallthrough
CT: control target
= control target key end

     0   :  { %7 = vsyncpa [#allocation3], 0  ;;  %s2612_s0 = inlined_call_operand.hbm [shape: f32[256,256], index: 0, kind: input, shape index: {}]   ;;  %s2613_s1 = inlined_call_operand.hbm [shape: f32[8,256], index: 1, kind: input, shape index: {}]   ;;  %s2614_s2 = inlined_call_operand.hbm [shape: f32[8,256], index: 2, kind: output, shape index: {}]  }
   0x1   :  { %8 = vsyncpa [#allocation6], 0 }
   0x2   :  { %9 = vsyncpa [#allocation4], 0  ;;  %s14_s11 = sshll.u32 %s2612_s0, 4  ;;  %s1575_s12 = smov [#allocation2]   ;;  %s15_s11 = int_to_ptr.hbm [resolvable:$true] %s14_s11 }
   0x3   :  { %s16_s13 = sshll.u32 %s1575_s12, 4  ;;  %s28_s16 = sshll.u32 %s2613_s1, 4  ;;  %s17_s13 = int_to_ptr.vmem [resolvable:$true] %s16_s13  ;;  %s29_s16 = int_to_ptr.hbm [resolvable:$true] %s28_s16 }
   0x4   :  { %s1576_s17 = smov 256   ;;  %s1577_s18 = smov 16  }
   0x5   :  { %22 = dma.hbm_to_vmem [thread:$0]  %s15_s11, 8192, %s17_s13, [#allocation3], %s1576_s17, %s1576_s17, %s1577_s18  }
   0x6   :  { %s1578_s19 = smov [#allocation5]  }
   0x7   :  { %s30_s20 = sshll.u32 %s1578_s19, 4  ;;  %s31_s20 = int_to_ptr.vmem [resolvable:$true] %s30_s20 }
   0x8   :  { %33 = dma.hbm_to_vmem [thread:$0]  %s29_s16, 256, %s31_s20, [#allocation6]  }
   0x9   :  { %1569 = dma.done.wait [#allocation3], 8192  }
   0xa   :  { %1570 = vsyncadd [#allocation3], 4294959104 }
   0xb   :  { %1571 = dma.done.wait [#allocation6], 256  }
   0xc   :  { %1572 = vsyncadd [#allocation6], 4294967040  ;;  %v74_v0 = vld [vmem:[#allocation2 + $0xf0] sm:$0xff]  ;;  %v72_v1 = vld [vmem:[#allocation2 + $0xe0] sm:$0xff]  ;;  %s1579_s0 = smov [#allocation7]   ;;  %s1481_s23 = sshll.u32 %s2614_s2, 4  ;;  %s1482_s23 = int_to_ptr.hbm [resolvable:$true] %s1481_s23 }
   0xd   :  { %v70_v2 = vld [vmem:[#allocation2 + $0xd0] sm:$0xff]  ;;  %v1601_v3 = vand.u32 4294901760, %v74_v0  ;;  %v1603_v4 = vand.u32 4294901760, %v72_v1  ;;  %v68_v6 = vld [vmem:[#allocation2 + $0xc0] sm:$0xff]  ;;  %s1479_s1 = sshll.u32 %s1579_s0, 4  ;;  %s1480_s1 = int_to_ptr.vmem [resolvable:$true] %s1479_s1 }
   0xe   :  { %v1605_v5 = vand.u32 4294901760, %v70_v2  ;;  %v66_v7 = vld [vmem:[#allocation2 + $0xb0] sm:$0xff]  ;;  %v64_v8 = vld [vmem:[#allocation2 + $0xa0] sm:$0xff]  ;;  %v1607_v9 = vand.u32 4294901760, %v68_v6 }
   0xf   :  { %v1609_v10 = vand.u32 4294901760, %v66_v7  ;;  %v1611_v11 = vand.u32 4294901760, %v64_v8  ;;  %v62_v12 = vld [vmem:[#allocation2 + $0x90] sm:$0xff]  ;;  %v60_v13 = vld [vmem:[#allocation2 + $0x80] sm:$0xff]  ;;  %109 = vmatpush.msra.mxu0 %v1601_v3  ;;  %v1615_v14 = vsub.f32 %v74_v0, %v1601_v3  ;;  %v1618_v15 = vsub.f32 %v72_v1, %v1603_v4  ;;  %305 = vmatpush.msra.mxu3 %v1601_v3 }
  0x10   :  { %v1622_v16 = vsub.f32 %v70_v2, %v1605_v5  ;;  %v1624_v17 = vand.u32 4294901760, %v62_v12  ;;  %v58_v18 = vld [vmem:[#allocation2 + $0x70] sm:$0xff]  ;;  %v1627_v19 = vsub.f32 %v68_v6, %v1607_v9  ;;  %v1640_v25 = vand.u32 4294901760, %v60_v13  ;;  %v56_v26 = vld [vmem:[#allocation2 + $0x60] sm:$0xff] }
  0x11   :  { %v1630_v20 = vsub.f32 %v66_v7, %v1609_v10  ;;  %v1633_v21 = vsub.f32 %v64_v8, %v1611_v11  ;;  %111 = vmatpush.msra.mxu0 %v1603_v4  ;;  %252 = vmatpush.msra.mxu2 %v1615_v14  ;;  %v151_v22 = vand.u32 4294901760, %v1615_v14  ;;  %v2630_v23 = vand.u32 4294901760, %v1618_v15  ;;  %v54_v34 = vld [vmem:[#allocation2 + $0x50] sm:$0xff]  ;;  %v52_v42 = vld [vmem:[#allocation2 + $0x40] sm:$0xff] }
  0x12   :  { %v2628_v24 = vand.u32 4294901760, %v1622_v16  ;;  %307 = vmatpush.msra.mxu3 %v1603_v4  ;;  %v2626_v27 = vand.u32 4294901760, %v1627_v19  ;;  %v1644_v28 = vand.u32 4294901760, %v58_v18  ;;  %v1647_v29 = vsub.f32 %v62_v12, %v1624_v17  ;;  %v50_v48 = vld [vmem:[#allocation2 + $0x30] sm:$0xff]  ;;  %v48_v54 = vld [vmem:[#allocation2 + $0x20] sm:$0xff] }
  0x13   :  { %113 = vmatpush.msra.mxu0 %v1605_v5  ;;  %255 = vmatpush.msra.mxu2 %v1618_v15  ;;  %v152_v30 = vsub.f32 %v1615_v14, %v151_v22  ;;  %v158_v31 = vsub.f32 %v1618_v15, %v2630_v23  ;;  %v2624_v33 = vand.u32 4294901760, %v1630_v20  ;;  %v1662_v35 = vand.u32 4294901760, %v56_v26  ;;  %v106_v59 = vld [vmem:[#allocation2 + $0x1f0] sm:$0xff]  ;;  %v44_v2 = vld [vmem:[#allocation2] sm:$0xff] }
  0x14   :  { %v164_v32 = vsub.f32 %v1622_v16, %v2628_v24  ;;  %309 = vmatpush.msra.mxu3 %v1605_v5  ;;  %v2622_v36 = vand.u32 4294901760, %v1633_v21  ;;  %v170_v39 = vsub.f32 %v1627_v19, %v2626_v27  ;;  %v1671_v40 = vsub.f32 %v60_v13, %v1640_v25  ;;  %v46_v61 = vld [vmem:[#allocation2 + $0x10] sm:$0xff]  ;;  %v104_v6 = vld [vmem:[#allocation2 + $0x1e0] sm:$0xff] }
  0x15   :  { %115 = vmatpush.msra.mxu0 %v1607_v9  ;;  %v153_v37 = vand.u32 4294901760, %v152_v30  ;;  %258 = vmatpush.msra.mxu2 %v1622_v16  ;;  %v159_v38 = vand.u32 4294901760, %v158_v31  ;;  %v1674_v41 = vand.u32 4294901760, %v54_v34  ;;  %v176_v44 = vsub.f32 %v1630_v20, %v2624_v33 }
  0x16   :  { %311 = vmatpush.msra.mxu3 %v1607_v9  ;;  %v165_v43 = vand.u32 4294901760, %v164_v32  ;;  %v2621_v45 = vand.u32 4294901760, %v1647_v29  ;;  %v1682_v46 = vsub.f32 %v58_v18, %v1644_v28  ;;  %v182_v47 = vsub.f32 %v1633_v21, %v2622_v36  ;;  %v102_v32 = vld [vmem:[#allocation2 + $0x1d0] sm:$0xff] }
  0x17   :  { %117 = vmatpush.msra.mxu0 %v1609_v10  ;;  %154 = vmatpush.msra.mxu1 %v153_v37  ;;  %v171_v49 = vand.u32 4294901760, %v170_v39  ;;  %v1690_v50 = vand.u32 4294901760, %v52_v42  ;;  %v2620_v51 = vand.u32 4294901760, %v1671_v40  ;;  %v1694_v52 = vsub.f32 %v56_v26, %v1662_v35 }
  0x18   :  { %261 = vmatpush.msra.mxu2 %v1627_v19  ;;  %313 = vmatpush.msra.mxu3 %v1609_v10  ;;  %v1699_v53 = vsub.f32 %v54_v34, %v1674_v41  ;;  %v177_v55 = vand.u32 4294901760, %v176_v44  ;;  %v188_v56 = vsub.f32 %v1647_v29, %v2621_v45  ;;  %v1705_v57 = vand.u32 4294901760, %v50_v48  ;;  %v100_v44 = vld [vmem:[#allocation2 + $0x1c0] sm:$0xff] }
  0x19   :  { %119 = vmatpush.msra.mxu0 %v1611_v11  ;;  %160 = vmatpush.msra.mxu1 %v159_v38  ;;  %v2619_v58 = vand.u32 4294901760, %v1682_v46  ;;  %v183_v60 = vand.u32 4294901760, %v182_v47  ;;  %v194_v62 = vsub.f32 %v1671_v40, %v2620_v51  ;;  %v1714_v63 = vand.u32 4294901760, %v48_v54  ;;  %v92_v45 = vld [vmem:[#allocation2 + $0x180] sm:$0xff] }
  0x1a   :  { %264 = vmatpush.msra.mxu2 %v1630_v20  ;;  %315 = vmatpush.msra.mxu3 %v1611_v11  ;;  %v2617_v0 = vand.u32 4294901760, %v1694_v52  ;;  %v1718_v1 = vsub.f32 %v52_v42, %v1690_v50  ;;  %v2616_v7 = vand.u32 4294901760, %v1699_v53  ;;  %v1723_v8 = vand.u32 4294901760, %v106_v59 }
  0x1b   :  { %121 = vmatpush.msra.mxu0 %v1624_v17  ;;  %166 = vmatpush.msra.mxu1 %v165_v43  ;;  %v189_v12 = vand.u32 4294901760, %v188_v56  ;;  %v200_v13 = vsub.f32 %v1682_v46, %v2619_v58  ;;  %v1729_v18 = vand.u32 4294901760, %v46_v61  ;;  %v1732_v26 = vsub.f32 %v50_v48, %v1705_v57 }
  0x1c   :  { %267 = vmatpush.msra.mxu2 %v1633_v21  ;;  %317 = vmatpush.msra.mxu3 %v1624_v17  ;;  %v1736_v30 = vand.u32 4294901760, %v44_v2  ;;  %v1738_v31 = vand.u32 4294901760, %v104_v6  ;;  %v195_v34 = vand.u32 4294901760, %v194_v62  ;;  %v206_v37 = vsub.f32 %v1694_v52, %v2617_v0 }
  0x1d   :  { %123 = vmatpush.msra.mxu0 %v1640_v25  ;;  %172 = vmatpush.msra.mxu1 %v171_v49  ;;  %v2615_v38 = vand.u32 4294901760, %v1718_v1  ;;  %v1746_v39 = vsub.f32 %v48_v54, %v1714_v63  ;;  %v212_v42 = vsub.f32 %v1699_v53, %v2616_v7  ;;  %v1754_v43 = vsub.f32 %v106_v59, %v1723_v8  ;;  %v98_v59 = vld [vmem:[#allocation2 + $0x1b0] sm:$0xff] }
  0x1e   :  { %270 = vmatpush.msra.mxu2 %v1647_v29  ;;  %319 = vmatpush.msra.mxu3 %v1640_v25  ;;  %2663 = vst [vmem:[#allocation11_spill] sm:$0xff] %v1736_v30  ;;  %v201_v47 = vand.u32 4294901760, %v200_v13  ;;  %v2618_v48 = vand.u32 4294901760, %v1732_v26  ;;  %v1759_v49 = vsub.f32 %v46_v61, %v1729_v18  ;;  %v1761_v54 = vand.u32 4294901760, %v102_v32  ;;  %v96_v13 = vld [vmem:[#allocation2 + $0x1a0] sm:$0xff] }
  0x1f   :  { %125 = vmatpush.msra.mxu0 %v1644_v28  ;;  %178 = vmatpush.msra.mxu1 %v177_v55  ;;  %v1766_v55 = vsub.f32 %v44_v2, %v1736_v30  ;;  %v1769_v56 = vsub.f32 %v104_v6, %v1738_v31  ;;  %v218_v61 = vsub.f32 %v1718_v1, %v2615_v38  ;;  %v2623_v62 = vand.u32 4294901760, %v1746_v39 }
  0x20   :  { %273 = vmatpush.msra.mxu2 %v1671_v40  ;;  %321 = vmatpush.msra.mxu3 %v1644_v28  ;;  %v213_v2 = vand.u32 4294901760, %v212_v42  ;;  %v2625_v6 = vand.u32 4294901760, %v1754_v43  ;;  %v1787_v38 = vsub.f32 %v102_v32, %v1761_v54  ;;  %v1789_v7 = vand.u32 4294901760, %v98_v59  ;;  %v94_v42 = vld [vmem:[#allocation2 + $0x190] sm:$0xff] }
  0x21   :  { %127 = vmatpush.msra.mxu0 %v1662_v35  ;;  %184 = vmatpush.msra.mxu1 %v183_v60  ;;  %v207_v60 = vand.u32 4294901760, %v206_v37  ;;  %v2627_v37 = vand.u32 4294901760, %v1759_v49  ;;  %v2631_v0 = vand.u32 4294901760, %v1766_v55  ;;  %v230_v32 = vsub.f32 %v1746_v39, %v2623_v62 }
  0x22   :  { %276 = vmatpush.msra.mxu2 %v1682_v46  ;;  %323 = vmatpush.msra.mxu3 %v1662_v35  ;;  %v1802_v51 = vand.u32 4294901760, %v96_v13  ;;  %v493_v36 = vsub.f32 %v1754_v43, %v2625_v6  ;;  %v2632_v62 = vand.u32 4294901760, %v1787_v38  ;;  %v1817_v33 = vsub.f32 %v98_v59, %v1789_v7 }
  0x23   :  { %129 = vmatpush.msra.mxu0 %v1674_v41  ;;  %190 = vmatpush.msra.mxu1 %v189_v12  ;;  %v1776_v12 = vand.u32 4294901760, %v100_v44  ;;  %v1824_v27 = vand.u32 4294901760, %v92_v45  ;;  %v242_v59 = vsub.f32 %v1766_v55, %v2631_v0  ;;  %v2664_v14 = vand.u32 4294901760, %v1618_v15 }
  0x24   :  { %279 = vmatpush.msra.mxu2 %v1694_v52  ;;  %325 = vmatpush.msra.mxu3 %v1674_v41  ;;  %v1832_v24 = vsub.f32 %v96_v13, %v1802_v51  ;;  %v505_v0 = vsub.f32 %v1787_v38, %v2632_v62  ;;  %v2666_v15 = vand.u32 4294901760, %v1622_v16  ;;  %v2668_v16 = vand.u32 4294901760, %v1627_v19 }
  0x25   :  { %131 = vmatpush.msra.mxu0 %v1690_v50  ;;  %196 = vmatpush.msra.mxu1 %v195_v34  ;;  %v224_v34 = vsub.f32 %v1732_v26, %v2618_v48  ;;  %v219_v48 = vand.u32 4294901760, %v218_v61  ;;  %v1800_v58 = vsub.f32 %v100_v44, %v1776_v12  ;;  %v236_v44 = vsub.f32 %v1759_v49, %v2627_v37 }
  0x26   :  { %282 = vmatpush.msra.mxu2 %v1699_v53  ;;  %327 = vmatpush.msra.mxu3 %v1690_v50  ;;  %v2670_v19 = vand.u32 4294901760, %v1630_v20  ;;  %v2672_v20 = vand.u32 4294901760, %v1633_v21  ;;  %v2675_v21 = vand.u32 4294901760, %v1647_v29  ;;  %v2677_v29 = vand.u32 4294901760, %v1671_v40 }
  0x27   :  { %133 = vmatpush.msra.mxu0 %v1705_v57  ;;  %202 = vmatpush.msra.mxu1 %v201_v47  ;;  %v2629_v47 = vand.u32 4294901760, %v1769_v56  ;;  %v225_v61 = vand.u32 4294901760, %v224_v34  ;;  %v231_v34 = vand.u32 4294901760, %v230_v32  ;;  %v237_v32 = vand.u32 4294901760, %v236_v44 }
  0x28   :  { %285 = vmatpush.msra.mxu2 %v1718_v1  ;;  %329 = vmatpush.msra.mxu3 %v1705_v57  ;;  %v2665_v44 = vand.u32 4294901760, %v1800_v58  ;;  %v2679_v40 = vand.u32 4294901760, %v1682_v46 }
  0x29   :  { %135 = vmatpush.msra.mxu0 %v1714_v63  ;;  %208 = vmatpush.msra.mxu1 %v207_v60  ;;  %v1809_v60 = vand.u32 4294901760, %v94_v42  ;;  %v499_v6 = vsub.f32 %v1769_v56, %v2629_v47  ;;  %v494_v47 = vand.u32 4294901760, %v493_v36  ;;  %v1851_v36 = vsub.f32 %v92_v45, %v1824_v27 }
  0x2a   :  { %288 = vmatpush.msra.mxu2 %v1732_v26  ;;  %331 = vmatpush.msra.mxu3 %v1714_v63  ;;  %v511_v62 = vsub.f32 %v1800_v58, %v2665_v44 }
  0x2b   :  { %137 = vmatpush.msra.mxu0 %v1729_v18  ;;  %214 = vmatpush.msra.mxu1 %v213_v2  ;;  %v90_v2 = vld [vmem:[#allocation2 + $0x170] sm:$0xff]  ;;  %v1838_v23 = vsub.f32 %v94_v42, %v1809_v60 }
  0x2c   :  { %291 = vmatpush.msra.mxu2 %v1746_v39  ;;  %333 = vmatpush.msra.mxu3 %v1729_v18  ;;  %v1845_v37 = vand.u32 4294901760, %v90_v2  ;;  %v86_v42 = vld [vmem:[#allocation2 + $0x150] sm:$0xff] }
  0x2d   :  { %139 = vmatpush.msra.mxu0 %v1736_v30  ;;  %220 = vmatpush.msra.mxu1 %v219_v48  ;;  %v88_v48 = vld [vmem:[#allocation2 + $0x160] sm:$0xff]  ;;  %v1870_v13 = vand.u32 4294901760, %v86_v42 }
  0x2e   :  { %294 = vmatpush.msra.mxu2 %v1759_v49  ;;  %335 = vmatpush.msra.mxu3 %v1736_v30  ;;  %v1858_v30 = vand.u32 4294901760, %v88_v48  ;;  %v1868_v44 = vsub.f32 %v90_v2, %v1845_v37 }
  0x2f   :  { %346 = vmatpush.msrb.mxu0 %v151_v22  ;;  %226 = vmatpush.msra.mxu1 %v225_v61  ;;  %v500_v22 = vand.u32 4294901760, %v499_v6  ;;  %v243_v61 = vand.u32 4294901760, %v242_v59  ;;  %v84_v6 = vld [vmem:[#allocation2 + $0x140] sm:$0xff]  ;;  %v2667_v59 = vand.u32 4294901760, %v1817_v33 }
  0x30   :  { %297 = vmatpush.msra.mxu2 %v1766_v55  ;;  %495 = vmatpush.msrb.mxu3 %v494_v47  ;;  %v1880_v2 = vsub.f32 %v88_v48, %v1858_v30  ;;  %v1882_v45 = vand.u32 4294901760, %v84_v6  ;;  %v1893_v48 = vsub.f32 %v86_v42, %v1870_v13 }
  0x31   :  { %350 = vmatpush.msrb.mxu0 %v2664_v14  ;;  %232 = vmatpush.msra.mxu1 %v231_v34  ;;  %v506_v34 = vand.u32 4294901760, %v505_v0  ;;  %v517_v14 = vsub.f32 %v1817_v33, %v2667_v59  ;;  %v512_v0 = vand.u32 4294901760, %v511_v62 }
  0x32   :  { %450 = vmatpush.msrb.mxu2 %v1723_v8  ;;  %501 = vmatpush.msrb.mxu3 %v500_v22  ;;  %v2671_v22 = vand.u32 4294901760, %v1838_v23  ;;  %v1906_v42 = vsub.f32 %v84_v6, %v1882_v45 }
  0x33   :  { %354 = vmatpush.msrb.mxu0 %v2666_v15  ;;  %238 = vmatpush.msra.mxu1 %v237_v32  ;;  %v82_v15 = vld [vmem:[#allocation2 + $0x130] sm:$0xff]  ;;  %v2669_v32 = vand.u32 4294901760, %v1832_v24  ;;  %v518_v62 = vand.u32 4294901760, %v517_v14 }
  0x34   :  { %452 = vmatpush.msrb.mxu2 %v1738_v31  ;;  %507 = vmatpush.msrb.mxu3 %v506_v34  ;;  %v1895_v47 = vand.u32 4294901760, %v82_v15 }
  0x35   :  { %358 = vmatpush.msrb.mxu0 %v2668_v16  ;;  %244 = vmatpush.msra.mxu1 %v243_v61  ;;  %v523_v59 = vsub.f32 %v1832_v24, %v2669_v32  ;;  %v529_v61 = vsub.f32 %v1838_v23, %v2671_v22  ;;  %v42_v16 = vld [vmem:[#allocation5] sm:$0xff] }
  0x36   :  { %454 = vmatpush.msrb.mxu2 %v1761_v54  ;;  %v80_v22 = vld [vmem:[#allocation2 + $0x120] sm:$0xff]  ;;  %513 = vmatpush.msrb.mxu3 %v512_v0  ;;  %v1908_v32 = vand.u32 4294901760, %v42_v16  ;;  %v2676_v0 = vand.u32 4294901760, %v1868_v44  ;;  %v1921_v14 = vsub.f32 %v82_v15, %v1895_v47 }
  0x37   :  { %362 = vmatpush.msrb.mxu0 %v2670_v19  ;;  %413 = vmatpush.msrb.mxu1 %v1601_v3  ;;  %v2673_v3 = vand.u32 4294901760, %v1851_v36  ;;  %v524_v34 = vand.u32 4294901760, %v523_v59  ;;  %v1918_v6 = vand.u32 4294901760, %v80_v22 }
  0x38   :  { %456 = vmatpush.msrb.mxu2 %v1776_v12  ;;  %2674 = vst [vmem:[#allocation12_spill] sm:$0xff] %v1908_v32  ;;  %519 = vmatpush.msrb.mxu3 %v518_v62  ;;  %v541_v59 = vsub.f32 %v1868_v44, %v2676_v0  ;;  %v1932_v0 = vsub.f32 %v42_v16, %v1908_v32 }
  0x39   :  { %366 = vmatpush.msrb.mxu0 %v2672_v20  ;;  %415 = vmatpush.msrb.mxu1 %v1603_v4  ;;  %v535_v19 = vsub.f32 %v1851_v36, %v2673_v3  ;;  %v530_v4 = vand.u32 4294901760, %v529_v61  ;;  %v78_v20 = vld [vmem:[#allocation2 + $0x110] sm:$0xff]  ;;  %v2678_v61 = vand.u32 4294901760, %v1880_v2  ;;  %v76_v3 = vld [vmem:[#allocation2 + $0x100] sm:$0xff]  ;;  %v1945_v16 = vsub.f32 %v80_v22, %v1918_v6 }
  0x3a   :  { %458 = vmatpush.msrb.mxu2 %v1789_v7  ;;  %525 = vmatpush.msrb.mxu3 %v524_v34  ;;  %v1934_v15 = vand.u32 4294901760, %v78_v20  ;;  %v1950_v46 = vand.u32 4294901760, %v76_v3 }
  0x3b   :  { %370 = vmatpush.msrb.mxu0 %v2675_v21  ;;  %417 = vmatpush.msrb.mxu1 %v1605_v5  ;;  %v536_v5 = vand.u32 4294901760, %v535_v19  ;;  %v547_v62 = vsub.f32 %v1880_v2, %v2678_v61  ;;  %v558_v21 = vand.u32 4294901760, %v1906_v42  ;;  %v2680_v19 = vand.u32 4294901760, %v1893_v48 }
  0x3c   :  { %460 = vmatpush.msrb.mxu2 %v1802_v51  ;;  %531 = vmatpush.msrb.mxu3 %v530_v4  ;;  %v2681_v61 = vand.u32 4294901760, %v1694_v52  ;;  %v1960_v22 = vsub.f32 %v78_v20, %v1934_v15  ;;  %v2683_v52 = vand.u32 4294901760, %v1699_v53  ;;  %v1974_v53 = vsub.f32 %v76_v3, %v1950_v46 }
  0x3d   :  { %374 = vmatpush.msrb.mxu0 %v2677_v29  ;;  %419 = vmatpush.msrb.mxu1 %v1607_v9  ;;  %v542_v9 = vand.u32 4294901760, %v541_v59  ;;  %v553_v34 = vsub.f32 %v1893_v48, %v2680_v19  ;;  %v564_v29 = vand.u32 4294901760, %v1921_v14  ;;  %v559_v4 = vsub.f32 %v1906_v42, %v558_v21 }
  0x3e   :  { %462 = vmatpush.msrb.mxu2 %v1809_v60  ;;  %537 = vmatpush.msrb.mxu3 %v536_v5  ;;  %v1957_v59 = vand.u32 4294901760, %v1932_v0  ;;  %v2684_v19 = vand.u32 4294901760, %v1718_v1  ;;  %v2687_v3 = vand.u32 4294901760, %v1746_v39  ;;  %v2690_v39 = vand.u32 4294901760, %v1766_v55 }
  0x3f   :  { %378 = vmatpush.msrb.mxu0 %v2679_v40  ;;  %421 = vmatpush.msrb.mxu1 %v1609_v10  ;;  %v548_v10 = vand.u32 4294901760, %v547_v62  ;;  %v554_v5 = vand.u32 4294901760, %v553_v34  ;;  %v565_v62 = vsub.f32 %v1921_v14, %v564_v29  ;;  %v570_v40 = vand.u32 4294901760, %v1945_v16 }
  0x40   :  { %464 = vmatpush.msrb.mxu2 %v1824_v27  ;;  %2682 = vst [vmem:[#allocation13_spill] sm:$0xff] %v1957_v59  ;;  %543 = vmatpush.msrb.mxu3 %v542_v9  ;;  %v143_v20 = vsub.f32 %v1932_v0, %v1957_v59  ;;  %v576_v9 = vand.u32 4294901760, %v1960_v22 }
  0x41   :  { %382 = vmatpush.msrb.mxu0 %v2681_v61  ;;  %423 = vmatpush.msrb.mxu1 %v1611_v11  ;;  %v43_v11 = vld [vmem:[#allocation5 + $0x8] sm:$0xff]  ;;  %v2686_v61 = vand.u32 4294901760, %v1732_v26  ;;  %v571_v1 = vsub.f32 %v1945_v16, %v570_v40 }
  0x42   :  { %466 = vmatpush.msrb.mxu2 %v1845_v37  ;;  %549 = vmatpush.msrb.mxu3 %v548_v10  ;;  %v1980_v34 = vand.u32 4294901760, %v43_v11  ;;  %v582_v10 = vand.u32 4294901760, %v1974_v53  ;;  %v1994_v26 = vand.u32 4294901760, %v143_v20 }
  0x43   :  { %386 = vmatpush.msrb.mxu0 %v2683_v52  ;;  %425 = vmatpush.msrb.mxu1 %v1624_v17  ;;  %v560_v17 = vand.u32 4294901760, %v559_v4  ;;  %v2689_v52 = vand.u32 4294901760, %v1759_v49 }
  0x44   :  { %468 = vmatpush.msrb.mxu2 %v1858_v30  ;;  %2685 = vst [vmem:[#allocation14_spill] sm:$0xff] %v1980_v34  ;;  %555 = vmatpush.msrb.mxu3 %v554_v5  ;;  %v2000_v4 = vsub.f32 %v43_v11, %v1980_v34  ;;  %v583_v5 = vsub.f32 %v1974_v53, %v582_v10 }
  0x45   :  { %390 = vmatpush.msrb.mxu0 %v2684_v19  ;;  %427 = vmatpush.msrb.mxu1 %v1640_v25  ;;  %v566_v25 = vand.u32 4294901760, %v565_v62  ;;  %v2695_v62 = vld [vmem:[#allocation11_spill] sm:$0xff] }
  0x46   :  { %470 = vmatpush.msrb.mxu2 %v1870_v13  ;;  %561 = vmatpush.msrb.mxu3 %v560_v17  ;;  %2688 = vst [vmem:[#allocation15_spill] sm:$0xff] %v2000_v4  ;;  %v59_v17 = vld [vmem:[#allocation2 + $0x78] sm:$0xff] }
  0x47   :  { %394 = vmatpush.msrb.mxu0 %v2686_v61  ;;  %429 = vmatpush.msrb.mxu1 %v1644_v28  ;;  %v577_v28 = vsub.f32 %v1960_v22, %v576_v9  ;;  %v57_v61 = vld [vmem:[#allocation2 + $0x68] sm:$0xff] }
  0x48   :  { %472 = vmatpush.msrb.mxu2 %v1882_v45  ;;  %567 = vmatpush.msrb.mxu3 %v566_v25  ;;  %v2162_v25 = vand.u32 4294901760, %v59_v17 }
  0x49   :  { %398 = vmatpush.msrb.mxu0 %v2687_v3  ;;  %431 = vmatpush.msrb.mxu1 %v1662_v35  ;;  %v572_v35 = vand.u32 4294901760, %v571_v1  ;;  %v578_v49 = vand.u32 4294901760, %v577_v28 }
  0x4a   :  { %474 = vmatpush.msrb.mxu2 %v1895_v47  ;;  %145 = vmatmul.f32.vlgmr.msra.gmra.mxu0 %v1994_v26 }
  0x4b   :  { %402 = vmatpush.msrb.mxu0 %v2689_v52  ;;  %433 = vmatpush.msrb.mxu1 %v1674_v41  ;;  %v2015_v41 = vand.u32 4294901760, %v2000_v4  ;;  %v55_v52 = vld [vmem:[#allocation2 + $0x58] sm:$0xff] }
  0x4c   :  { %476 = vmatpush.msrb.mxu2 %v1918_v6  ;;  %573 = vmatpush.msrb.mxu3 %v572_v35 }
  0x4d   :  { %406 = vmatpush.msrb.mxu0 %v2690_v39  ;;  %435 = vmatpush.msrb.mxu1 %v1690_v50  ;;  %2691 = vst [vmem:[#allocation16_spill] sm:$0xff] %v2015_v41  ;;  %v584_v50 = vand.u32 4294901760, %v583_v5  ;;  %v484_v55 = vsub.f32 %v2000_v4, %v2015_v41 }
  0x4e   :  { %478 = vmatpush.msrb.mxu2 %v1934_v15  ;;  %579 = vmatpush.msrb.mxu3 %v578_v49 }
  0x4f   :  { %593 = vmatpush.msra.mxu0 %v1754_v43  ;;  %437 = vmatpush.msrb.mxu1 %v1705_v57  ;;  %v2692_v57 = vand.u32 4294901760, %v1754_v43  ;;  %v2034_v11 = vand.u32 4294901760, %v484_v55  ;;  %v2697_v43 = vand.u32 4294901760, %v1800_v58 }
  0x50   :  { %300 = vmatmul.f32.vlgmr.msra.gmra.mxu2 %v1932_v0  ;;  %339 = vmatmul.f32.vlgmr.msra.gmra.mxu3 %v1957_v59 }
  0x51   :  { %596 = vmatpush.msra.mxu0 %v1769_v56  ;;  %439 = vmatpush.msrb.mxu1 %v1714_v63  ;;  %v2693_v63 = vand.u32 4294901760, %v1769_v56  ;;  %2694 = vst [vmem:[#allocation17_spill] sm:$0xff] %v2034_v11  ;;  %v2704_v56 = vand.u32 4294901760, %v1893_v48 }
  0x52   :  { %480 = vmatpush.msrb.mxu2 %v1950_v46  ;;  %585 = vmatpush.msrb.mxu3 %v584_v50  ;;  %v2189_v50 = vsub.f32 %v59_v17, %v2162_v25  ;;  %v107_v17 = vld [vmem:[#allocation2 + $0x1f8] sm:$0xff] }
  0x53   :  { %599 = vmatpush.msra.mxu0 %v1787_v38  ;;  %441 = vmatpush.msrb.mxu1 %v1729_v18  ;;  %v2696_v18 = vand.u32 4294901760, %v1787_v38 }
  0x54   :  { %687 = vmatpush.msra.mxu2 %v2692_v57  ;;  %246 = vmatmul.f32.vlgmr.msra.gmra.mxu1 %v1908_v32 }
  0x55   :  { %602 = vmatpush.msra.mxu0 %v1800_v58  ;;  %754 = vmatpush.msra.mxu3 %v1723_v8  ;;  %v2699_v58 = vand.u32 4294901760, %v1832_v24 }
  0x56   :  { %691 = vmatpush.msra.mxu2 %v2693_v63  ;;  %443 = vmatpush.msrb.mxu1 %v2695_v62  ;;  %v2195_v63 = vand.u32 4294901760, %v55_v52 }
  0x57   :  { %605 = vmatpush.msra.mxu0 %v1817_v33  ;;  %756 = vmatpush.msra.mxu3 %v1738_v31 }
  0x58   :  { %646 = vmatpush.msra.mxu1 %v1723_v8  ;;  %695 = vmatpush.msra.mxu2 %v2696_v18  ;;  %v2698_v8 = vand.u32 4294901760, %v1817_v33  ;;  %v2700_v33 = vand.u32 4294901760, %v1838_v23 }
  0x59   :  { %486 = vmatmul.f32.vlgmr.msrb.gmra.mxu2 %v2034_v11  ;;  %608 = vmatpush.msra.mxu0 %v1832_v24  ;;  %v75_v24 = vld [vmem:[#allocation2 + $0xf8] sm:$0xff] }
  0x5a   :  { %648 = vmatpush.msra.mxu1 %v1738_v31  ;;  %699 = vmatpush.msra.mxu2 %v2697_v43  ;;  %v2701_v31 = vand.u32 4294901760, %v1851_v36  ;;  %v2082_v38 = vand.u32 4294901760, %v75_v24  ;;  %v51_v43 = vld [vmem:[#allocation2 + $0x38] sm:$0xff] }
  0x5b   :  { %758 = vmatpush.msra.mxu3 %v1761_v54  ;;  %408 = vmatmul.f32.vlgmr.msrb.gmra.mxu0 %v1908_v32 }
  0x5c   :  { %587 = vmatmul.f32.vlgmr.msrb.gmra.mxu3 %v1980_v34  ;;  %611 = vmatpush.msra.mxu0 %v1838_v23  ;;  %v73_v23 = vld [vmem:[#allocation2 + $0xe8] sm:$0xff] }
  0x5d   :  { %650 = vmatpush.msra.mxu1 %v1761_v54  ;;  %703 = vmatpush.msra.mxu2 %v2698_v8  ;;  %v71_v54 = vld [vmem:[#allocation2 + $0xd8] sm:$0xff] }
  0x5e   :  { %760 = vmatpush.msra.mxu3 %v1776_v12  ;;  %445 = vmatmul.f32.vlgmr.msrb.gmra.mxu1 %v1908_v32 }
  0x5f   :  { %614 = vmatpush.msra.mxu0 %v1851_v36  ;;  %652 = vmatpush.msra.mxu1 %v1776_v12  ;;  %v2089_v12 = vand.u32 4294901760, %v73_v23  ;;  %v67_v36 = vld [vmem:[#allocation2 + $0xb8] sm:$0xff] }
  0x60   :  { %707 = vmatpush.msra.mxu2 %v2699_v58  ;;  %762 = vmatpush.msra.mxu3 %v1789_v7 }
  0x61   :  { %617 = vmatpush.msra.mxu0 %v1868_v44  ;;  %654 = vmatpush.msra.mxu1 %v1789_v7  ;;  %v2702_v7 = vand.u32 4294901760, %v1868_v44  ;;  %v2109_v44 = vsub.f32 %v73_v23, %v2089_v12 }
  0x62   :  { %711 = vmatpush.msra.mxu2 %v2700_v33  ;;  %764 = vmatpush.msra.mxu3 %v1802_v51 }
  0x63   :  { %620 = vmatpush.msra.mxu0 %v1880_v2  ;;  %656 = vmatpush.msra.mxu1 %v1802_v51  ;;  %v2703_v51 = vand.u32 4294901760, %v1880_v2  ;;  %v65_v2 = vld [vmem:[#allocation2 + $0xa8] sm:$0xff] }
  0x64   :  { %715 = vmatpush.msra.mxu2 %v2701_v31  ;;  %766 = vmatpush.msra.mxu3 %v1809_v60 }
  0x65   :  { %623 = vmatpush.msra.mxu0 %v1893_v48  ;;  %658 = vmatpush.msra.mxu1 %v1809_v60  ;;  %v2096_v60 = vand.u32 4294901760, %v71_v54 }
  0x66   :  { %719 = vmatpush.msra.mxu2 %v2702_v7  ;;  %768 = vmatpush.msra.mxu3 %v1824_v27  ;;  %v49_v7 = vld [vmem:[#allocation2 + $0x28] sm:$0xff] }
  0x67   :  { %626 = vmatpush.msra.mxu0 %v1906_v42  ;;  %660 = vmatpush.msra.mxu1 %v1824_v27  ;;  %v69_v27 = vld [vmem:[#allocation2 + $0xc8] sm:$0xff]  ;;  %v63_v42 = vld [vmem:[#allocation2 + $0x98] sm:$0xff] }
  0x68   :  { %723 = vmatpush.msra.mxu2 %v2703_v51  ;;  %770 = vmatpush.msra.mxu3 %v1845_v37 }
  0x69   :  { %629 = vmatpush.msra.mxu0 %v1921_v14  ;;  %662 = vmatpush.msra.mxu1 %v1845_v37  ;;  %v2099_v37 = vsub.f32 %v75_v24, %v2082_v38  ;;  %v2120_v14 = vsub.f32 %v71_v54, %v2096_v60  ;;  %v2635_v24 = vand.u32 4294901760, %v2189_v50  ;;  %v2217_v54 = vand.u32 4294901760, %v51_v43 }
  0x6a   :  { %727 = vmatpush.msra.mxu2 %v2704_v56  ;;  %772 = vmatpush.msra.mxu3 %v1858_v30  ;;  %v2220_v56 = vsub.f32 %v55_v52, %v2195_v63 }
  0x6b   :  { %632 = vmatpush.msra.mxu0 %v1945_v16  ;;  %664 = vmatpush.msra.mxu1 %v1858_v30  ;;  %v2106_v30 = vand.u32 4294901760, %v69_v27  ;;  %v2647_v48 = vand.u32 4294901760, %v2099_v37  ;;  %v61_v16 = vld [vmem:[#allocation2 + $0x88] sm:$0xff] }
  0x6c   :  { %731 = vmatpush.msra.mxu2 %v558_v21  ;;  %774 = vmatpush.msra.mxu3 %v1870_v13  ;;  %v2645_v21 = vand.u32 4294901760, %v2109_v44  ;;  %v2636_v52 = vand.u32 4294901760, %v2220_v56 }
  0x6d   :  { %635 = vmatpush.msra.mxu0 %v1960_v22  ;;  %666 = vmatpush.msra.mxu1 %v1870_v13  ;;  %v2116_v13 = vand.u32 4294901760, %v67_v36  ;;  %v2141_v22 = vand.u32 4294901760, %v63_v42 }
  0x6e   :  { %735 = vmatpush.msra.mxu2 %v564_v29  ;;  %776 = vmatpush.msra.mxu3 %v1882_v45  ;;  %v2131_v29 = vsub.f32 %v69_v27, %v2106_v30 }
  0x6f   :  { %638 = vmatpush.msra.mxu0 %v1974_v53  ;;  %668 = vmatpush.msra.mxu1 %v1882_v45  ;;  %v2127_v45 = vand.u32 4294901760, %v65_v2  ;;  %v2145_v19 = vsub.f32 %v67_v36, %v2116_v13  ;;  %v2154_v53 = vand.u32 4294901760, %v61_v16  ;;  %v2171_v28 = vsub.f32 %v63_v42, %v2141_v22  ;;  %v47_v36 = vld [vmem:[#allocation2 + $0x18] sm:$0xff] }
  0x70   :  { %739 = vmatpush.msra.mxu2 %v570_v40  ;;  %778 = vmatpush.msra.mxu3 %v1895_v47  ;;  %v2644_v40 = vand.u32 4294901760, %v2120_v14  ;;  %v2642_v20 = vand.u32 4294901760, %v2131_v29 }
  0x71   :  { %641 = vmatmul.f32.vlgmr.msra.gmra.mxu0 %v2000_v4  ;;  %670 = vmatpush.msra.mxu1 %v1895_v47  ;;  %v834_v47 = vsub.f32 %v2099_v37, %v2647_v48  ;;  %v2184_v49 = vsub.f32 %v61_v16, %v2154_v53  ;;  %v2638_v62 = vand.u32 4294901760, %v2171_v28  ;;  %v2229_v16 = vand.u32 4294901760, %v49_v7 }
  0x72   :  { %791 = vmatpush.msrb.mxu0 %v2082_v38  ;;  %743 = vmatpush.msra.mxu2 %v576_v9  ;;  %v2158_v9 = vsub.f32 %v65_v2, %v2127_v45  ;;  %v846_v3 = vsub.f32 %v2120_v14, %v2644_v40  ;;  %v852_v39 = vsub.f32 %v2131_v29, %v2642_v20 }
  0x73   :  { %780 = vmatpush.msra.mxu3 %v1918_v6  ;;  %672 = vmatpush.msra.mxu1 %v1918_v6  ;;  %v840_v6 = vsub.f32 %v2109_v44, %v2645_v21  ;;  %v835_v1 = vand.u32 4294901760, %v834_v47  ;;  %v2637_v31 = vand.u32 4294901760, %v2184_v49  ;;  %v870_v51 = vsub.f32 %v2171_v28, %v2638_v62 }
  0x74   :  { %793 = vmatpush.msrb.mxu0 %v2089_v12  ;;  %747 = vmatpush.msra.mxu2 %v582_v10  ;;  %v2641_v10 = vand.u32 4294901760, %v2145_v19  ;;  %v2639_v5 = vand.u32 4294901760, %v2158_v9  ;;  %v847_v55 = vand.u32 4294901760, %v846_v3  ;;  %v853_v8 = vand.u32 4294901760, %v852_v39 }
  0x75   :  { %782 = vmatpush.msra.mxu3 %v1934_v15  ;;  %749 = vmatmul.f32.vlgmr.msra.gmra.mxu2 %v1980_v34  ;;  %v841_v35 = vand.u32 4294901760, %v840_v6  ;;  %v876_v42 = vsub.f32 %v2184_v49, %v2637_v31  ;;  %v882_v6 = vsub.f32 %v2189_v50, %v2635_v24  ;;  %v2240_v3 = vand.u32 4294901760, %v47_v36  ;;  %v101_v24 = vld [vmem:[#allocation2 + $0x1c8] sm:$0xff] }
  0x76   :  { %795 = vmatpush.msrb.mxu0 %v2096_v60  ;;  %934 = vmatpush.msrb.mxu2 %v2099_v37  ;;  %v858_v57 = vsub.f32 %v2145_v19, %v2641_v10  ;;  %v864_v58 = vsub.f32 %v2158_v9, %v2639_v5  ;;  %v99_v5 = vld [vmem:[#allocation2 + $0x1b8] sm:$0xff] }
  0x77   :  { %674 = vmatpush.msra.mxu1 %v1934_v15  ;;  %784 = vmatpush.msra.mxu3 %v1950_v46  ;;  %v2175_v15 = vand.u32 4294901760, %v57_v61  ;;  %v2302_v20 = vand.u32 4294901760, %v99_v5 }
  0x78   :  { %786 = vmatmul.f32.vlgmr.msra.gmra.mxu3 %v1980_v34  ;;  %797 = vmatpush.msrb.mxu0 %v2106_v30  ;;  %v859_v23 = vand.u32 4294901760, %v858_v57  ;;  %v865_v2 = vand.u32 4294901760, %v864_v58  ;;  %v877_v57 = vand.u32 4294901760, %v876_v42  ;;  %v2258_v58 = vsub.f32 %v49_v7, %v2229_v16 }
  0x79   :  { %937 = vmatpush.msrb.mxu2 %v2109_v44  ;;  %987 = vmatpush.msrb.mxu3 %v2082_v38  ;;  %v2201_v18 = vsub.f32 %v57_v61, %v2175_v15  ;;  %v45_v61 = vld [vmem:[#allocation2 + $0x8] sm:$0xff]  ;;  %v2707_v34 = vand.u32 4294901760, %v2099_v37 }
  0x7a   :  { %676 = vmatpush.msra.mxu1 %v1950_v46  ;;  %799 = vmatpush.msrb.mxu0 %v2116_v13  ;;  %v53_v46 = vld [vmem:[#allocation2 + $0x48] sm:$0xff] }
  0x7b   :  { %680 = vmatmul.f32.vlgmr.msra.gmra.mxu1 %v2015_v41  ;;  %940 = vmatpush.msrb.mxu2 %v2120_v14  ;;  %v2207_v33 = vand.u32 4294901760, %v53_v46  ;;  %v2634_v27 = vand.u32 4294901760, %v2201_v18 }
  0x7c   :  { %836 = vmatpush.msrb.mxu1 %v835_v1  ;;  %989 = vmatpush.msrb.mxu3 %v2089_v12  ;;  %v871_v1 = vand.u32 4294901760, %v870_v51  ;;  %v103_v51 = vld [vmem:[#allocation2 + $0x1d8] sm:$0xff] }
  0x7d   :  { %801 = vmatpush.msrb.mxu0 %v2127_v45  ;;  %943 = vmatpush.msrb.mxu2 %v2131_v29  ;;  %v2232_v47 = vsub.f32 %v53_v46, %v2207_v33  ;;  %v888_v39 = vsub.f32 %v2201_v18, %v2634_v27  ;;  %v2251_v46 = vand.u32 4294901760, %v107_v17  ;;  %v2268_v27 = vsub.f32 %v47_v36, %v2240_v3 }
  0x7e   :  { %842 = vmatpush.msrb.mxu1 %v841_v35  ;;  %991 = vmatpush.msrb.mxu3 %v2096_v60  ;;  %v2244_v35 = vsub.f32 %v51_v43, %v2217_v54  ;;  %v2646_v36 = vand.u32 4294901760, %v2258_v58  ;;  %v2285_v62 = vand.u32 4294901760, %v103_v51 }
  0x7f   :  { %803 = vmatpush.msrb.mxu0 %v2141_v22  ;;  %946 = vmatpush.msrb.mxu2 %v2145_v19  ;;  %v2640_v43 = vand.u32 4294901760, %v2232_v47 }
  0x80   :  { %848 = vmatpush.msrb.mxu1 %v847_v55  ;;  %993 = vmatpush.msrb.mxu3 %v2106_v30  ;;  %v105_v55 = vld [vmem:[#allocation2 + $0x1e8] sm:$0xff]  ;;  %v2643_v42 = vand.u32 4294901760, %v2244_v35  ;;  %v2310_v40 = vsub.f32 %v103_v51, %v2285_v62 }
  0x81   :  { %805 = vmatpush.msrb.mxu0 %v2154_v53  ;;  %949 = vmatpush.msrb.mxu2 %v2158_v9  ;;  %v2270_v7 = vand.u32 4294901760, %v105_v55 }
  0x82   :  { %854 = vmatpush.msrb.mxu1 %v853_v8  ;;  %995 = vmatpush.msrb.mxu3 %v2116_v13  ;;  %v2254_v8 = vand.u32 4294901760, %v45_v61 }
  0x83   :  { %807 = vmatpush.msrb.mxu0 %v2162_v25  ;;  %952 = vmatpush.msrb.mxu2 %v2171_v28  ;;  %2706 = vst [vmem:[#allocation18_spill] sm:$0xff] %v2270_v7 }
  0x84   :  { %860 = vmatpush.msrb.mxu1 %v859_v23  ;;  %997 = vmatpush.msrb.mxu3 %v2127_v45  ;;  %2705 = vst [vmem:[#allocation11_spill] sm:$0xff] %v2254_v8  ;;  %v883_v23 = vand.u32 4294901760, %v882_v6  ;;  %v889_v6 = vand.u32 4294901760, %v888_v39  ;;  %v2283_v31 = vsub.f32 %v45_v61, %v2254_v8  ;;  %v2648_v61 = vand.u32 4294901760, %v2268_v27 }
  0x85   :  { %809 = vmatpush.msrb.mxu0 %v2175_v15  ;;  %955 = vmatpush.msrb.mxu2 %v2184_v49 }
  0x86   :  { %866 = vmatpush.msrb.mxu1 %v865_v2  ;;  %999 = vmatpush.msrb.mxu3 %v2141_v22  ;;  %v894_v2 = vsub.f32 %v2220_v56, %v2636_v52  ;;  %v900_v52 = vsub.f32 %v2232_v47, %v2640_v43  ;;  %v2297_v43 = vsub.f32 %v105_v55, %v2270_v7  ;;  %v2654_v55 = vand.u32 4294901760, %v2283_v31 }
  0x87   :  { %811 = vmatpush.msrb.mxu0 %v2195_v63  ;;  %958 = vmatpush.msrb.mxu2 %v2189_v50 }
  0x88   :  { %872 = vmatpush.msrb.mxu1 %v871_v1  ;;  %1001 = vmatpush.msrb.mxu3 %v2154_v53  ;;  %v2275_v1 = vsub.f32 %v107_v17, %v2251_v46  ;;  %v2289_v17 = vand.u32 4294901760, %v101_v24  ;;  %v895_v39 = vand.u32 4294901760, %v894_v2  ;;  %v901_v2 = vand.u32 4294901760, %v900_v52 }
  0x89   :  { %813 = vmatpush.msrb.mxu0 %v2207_v33  ;;  %961 = vmatpush.msrb.mxu2 %v2201_v18  ;;  %v924_v48 = vsub.f32 %v2283_v31, %v2654_v55 }
  0x8a   :  { %878 = vmatpush.msrb.mxu1 %v877_v57  ;;  %1003 = vmatpush.msrb.mxu3 %v2162_v25  ;;  %v906_v57 = vsub.f32 %v2244_v35, %v2643_v42  ;;  %v2653_v10 = vand.u32 4294901760, %v2275_v1  ;;  %v912_v42 = vsub.f32 %v2258_v58, %v2646_v36  ;;  %v2315_v21 = vsub.f32 %v101_v24, %v2289_v17 }
  0x8b   :  { %815 = vmatpush.msrb.mxu0 %v2217_v54  ;;  %964 = vmatpush.msrb.mxu2 %v2220_v56  ;;  %v918_v36 = vsub.f32 %v2268_v27, %v2648_v61 }
  0x8c   :  { %884 = vmatpush.msrb.mxu1 %v883_v23  ;;  %1005 = vmatpush.msrb.mxu3 %v2175_v15  ;;  %v97_v23 = vld [vmem:[#allocation2 + $0x1a8] sm:$0xff]  ;;  %v907_v52 = vand.u32 4294901760, %v906_v57  ;;  %v1175_v24 = vsub.f32 %v2275_v1, %v2653_v10  ;;  %v913_v61 = vand.u32 4294901760, %v912_v42  ;;  %v91_v10 = vld [vmem:[#allocation2 + $0x178] sm:$0xff] }
  0x8d   :  { %817 = vmatpush.msrb.mxu0 %v2229_v16  ;;  %967 = vmatpush.msrb.mxu2 %v2232_v47  ;;  %v2322_v51 = vand.u32 4294901760, %v97_v23  ;;  %v93_v57 = vld [vmem:[#allocation2 + $0x188] sm:$0xff]  ;;  %v919_v42 = vand.u32 4294901760, %v918_v36  ;;  %v925_v36 = vand.u32 4294901760, %v924_v48  ;;  %v2363_v59 = vand.u32 4294901760, %v91_v10 }
  0x8e   :  { %890 = vmatpush.msrb.mxu1 %v889_v6  ;;  %1007 = vmatpush.msrb.mxu3 %v2195_v63  ;;  %v95_v6 = vld [vmem:[#allocation2 + $0x198] sm:$0xff]  ;;  %v2350_v11 = vand.u32 4294901760, %v93_v57  ;;  %v1176_v37 = vand.u32 4294901760, %v1175_v24  ;;  %v2712_v24 = vand.u32 4294901760, %v2315_v21 }
  0x8f   :  { %819 = vmatpush.msrb.mxu0 %v2240_v3  ;;  %970 = vmatpush.msrb.mxu2 %v2244_v35  ;;  %v2337_v4 = vand.u32 4294901760, %v95_v6  ;;  %v2348_v41 = vsub.f32 %v97_v23, %v2322_v51 }
  0x90   :  { %896 = vmatpush.msrb.mxu1 %v895_v39  ;;  %1009 = vmatpush.msrb.mxu3 %v2207_v33  ;;  %v2330_v39 = vsub.f32 %v99_v5, %v2302_v20  ;;  %v89_v5 = vld [vmem:[#allocation2 + $0x168] sm:$0xff] }
  0x91   :  { %821 = vmatpush.msrb.mxu0 %v2254_v8  ;;  %973 = vmatpush.msrb.mxu2 %v2258_v58  ;;  %v2361_v32 = vsub.f32 %v95_v6, %v2337_v4  ;;  %v2374_v6 = vsub.f32 %v93_v57, %v2350_v11  ;;  %v2386_v57 = vsub.f32 %v91_v10, %v2363_v59 }
  0x92   :  { %902 = vmatpush.msrb.mxu1 %v901_v2  ;;  %1011 = vmatpush.msrb.mxu3 %v2217_v54  ;;  %v2708_v2 = vand.u32 4294901760, %v2297_v43 }
  0x93   :  { %1028 = vmatpush.msra.mxu0 %v2707_v34  ;;  %976 = vmatpush.msrb.mxu2 %v2268_v27  ;;  %v2709_v34 = vand.u32 4294901760, %v2109_v44  ;;  %v2711_v44 = vand.u32 4294901760, %v2120_v14  ;;  %v2713_v14 = vand.u32 4294901760, %v2131_v29  ;;  %v2715_v29 = vand.u32 4294901760, %v2145_v19 }
  0x94   :  { %908 = vmatpush.msrb.mxu1 %v907_v52  ;;  %1013 = vmatpush.msrb.mxu3 %v2229_v16  ;;  %v1181_v55 = vsub.f32 %v2297_v43, %v2708_v2  ;;  %v2710_v2 = vand.u32 4294901760, %v2310_v40  ;;  %v2376_v52 = vand.u32 4294901760, %v89_v5  ;;  %v2717_v19 = vand.u32 4294901760, %v2158_v9 }
  0x95   :  { %1032 = vmatpush.msra.mxu0 %v2709_v34  ;;  %979 = vmatpush.msrb.mxu2 %v2283_v31  ;;  %v87_v34 = vld [vmem:[#allocation2 + $0x158] sm:$0xff]  ;;  %v2718_v9 = vand.u32 4294901760, %v2171_v28 }
  0x96   :  { %914 = vmatpush.msrb.mxu1 %v913_v61  ;;  %1015 = vmatpush.msrb.mxu3 %v2240_v3  ;;  %v1187_v23 = vsub.f32 %v2310_v40, %v2710_v2  ;;  %v1193_v61 = vsub.f32 %v2315_v21, %v2712_v24  ;;  %v1182_v48 = vand.u32 4294901760, %v1181_v55  ;;  %v2662_v2 = vand.u32 4294901760, %v2361_v32 }
  0x97   :  { %1036 = vmatpush.msra.mxu0 %v2711_v44  ;;  %1132 = vmatpush.msra.mxu2 %v2251_v46  ;;  %v2714_v44 = vand.u32 4294901760, %v2330_v39  ;;  %v2399_v10 = vsub.f32 %v89_v5, %v2376_v52 }
  0x98   :  { %920 = vmatpush.msrb.mxu1 %v919_v42  ;;  %1017 = vmatpush.msrb.mxu3 %v2254_v8  ;;  %v85_v42 = vld [vmem:[#allocation2 + $0x148] sm:$0xff]  ;;  %v1188_v55 = vand.u32 4294901760, %v1187_v23  ;;  %v2388_v8 = vand.u32 4294901760, %v87_v34  ;;  %v1216_v23 = vand.u32 4294901760, %v2374_v6 }
  0x99   :  { %1040 = vmatpush.msra.mxu0 %v2713_v14  ;;  %1134 = vmatpush.msra.mxu2 %v2270_v7  ;;  %v1199_v24 = vsub.f32 %v2330_v39, %v2714_v44  ;;  %v1194_v14 = vand.u32 4294901760, %v1193_v61  ;;  %v83_v7 = vld [vmem:[#allocation2 + $0x138] sm:$0xff]  ;;  %v2401_v44 = vand.u32 4294901760, %v85_v42  ;;  %v1211_v61 = vsub.f32 %v2361_v32, %v2662_v2 }
  0x9a   :  { %1177 = vmatpush.msra.mxu3 %v1176_v37  ;;  %926 = vmatpush.msrb.mxu1 %v925_v36  ;;  %v2716_v37 = vand.u32 4294901760, %v2348_v41  ;;  %v2412_v5 = vsub.f32 %v87_v34, %v2388_v8  ;;  %v2719_v2 = vand.u32 4294901760, %v2184_v49  ;;  %v2720_v49 = vand.u32 4294901760, %v2189_v50 }
  0x9b   :  { %1044 = vmatpush.msra.mxu0 %v2715_v29  ;;  %1136 = vmatpush.msra.mxu2 %v2285_v62  ;;  %v2414_v29 = vand.u32 4294901760, %v83_v7  ;;  %v2425_v34 = vsub.f32 %v85_v42, %v2401_v44  ;;  %v1212_v28 = vand.u32 4294901760, %v1211_v61 }
  0x9c   :  { %1095 = vmatpush.msra.mxu1 %v2082_v38  ;;  %1183 = vmatpush.msra.mxu3 %v1182_v48  ;;  %v1205_v36 = vsub.f32 %v2348_v41, %v2716_v37  ;;  %v1200_v38 = vand.u32 4294901760, %v1199_v24  ;;  %v1222_v48 = vand.u32 4294901760, %v2386_v57  ;;  %v81_v37 = vld [vmem:[#allocation2 + $0x128] sm:$0xff]  ;;  %v1217_v24 = vsub.f32 %v2374_v6, %v1216_v23 }
  0x9d   :  { %1048 = vmatpush.msra.mxu0 %v2717_v19  ;;  %1138 = vmatpush.msra.mxu2 %v2289_v17  ;;  %v79_v19 = vld [vmem:[#allocation2 + $0x118] sm:$0xff]  ;;  %v2438_v42 = vsub.f32 %v83_v7, %v2414_v29  ;;  %v2721_v7 = vand.u32 4294901760, %v2201_v18  ;;  %v2722_v18 = vand.u32 4294901760, %v2220_v56 }
  0x9e   :  { %1097 = vmatpush.msra.mxu1 %v2089_v12  ;;  %1189 = vmatpush.msra.mxu3 %v1188_v55  ;;  %v1206_v12 = vand.u32 4294901760, %v1205_v36  ;;  %v1228_v55 = vand.u32 4294901760, %v2399_v10  ;;  %v1234_v36 = vand.u32 4294901760, %v2412_v5 }
  0x9f   :  { %1052 = vmatpush.msra.mxu0 %v2718_v9  ;;  %1140 = vmatpush.msra.mxu2 %v2302_v20  ;;  %v1240_v9 = vand.u32 4294901760, %v2425_v34 }
  0xa0   :  { %1099 = vmatpush.msra.mxu1 %v2096_v60  ;;  %1195 = vmatpush.msra.mxu3 %v1194_v14  ;;  %v2430_v60 = vand.u32 4294901760, %v81_v37  ;;  %v1223_v14 = vsub.f32 %v2386_v57, %v1222_v48  ;;  %v1229_v61 = vsub.f32 %v2399_v10, %v1228_v55 }
  0xa1   :  { %1056 = vmatpush.msra.mxu0 %v2719_v2  ;;  %1142 = vmatpush.msra.mxu2 %v2322_v51  ;;  %v77_v2 = vld [vmem:[#allocation2 + $0x108] sm:$0xff] }
  0xa2   :  { %1101 = vmatpush.msra.mxu1 %v2106_v30  ;;  %1201 = vmatpush.msra.mxu3 %v1200_v38  ;;  %v2443_v30 = vand.u32 4294901760, %v79_v19  ;;  %v1218_v38 = vand.u32 4294901760, %v1217_v24  ;;  %v1224_v50 = vand.u32 4294901760, %v1223_v14  ;;  %v1246_v24 = vand.u32 4294901760, %v2438_v42 }
  0xa3   :  { %1060 = vmatpush.msra.mxu0 %v2720_v49  ;;  %1144 = vmatpush.msra.mxu2 %v2337_v4  ;;  %v2461_v49 = vand.u32 4294901760, %v77_v2  ;;  %v2723_v14 = vand.u32 4294901760, %v2232_v47 }
  0xa4   :  { %1103 = vmatpush.msra.mxu1 %v2116_v13  ;;  %1207 = vmatpush.msra.mxu3 %v1206_v12  ;;  %v2454_v13 = vsub.f32 %v81_v37, %v2430_v60  ;;  %v1235_v12 = vsub.f32 %v2412_v5, %v1234_v36  ;;  %v1230_v37 = vand.u32 4294901760, %v1229_v61  ;;  %v2724_v61 = vand.u32 4294901760, %v2244_v35 }
  0xa5   :  { %1064 = vmatpush.msra.mxu0 %v2721_v7  ;;  %1146 = vmatpush.msra.mxu2 %v2350_v11  ;;  %v2725_v7 = vand.u32 4294901760, %v2258_v58 }
  0xa6   :  { %1105 = vmatpush.msra.mxu1 %v2127_v45  ;;  %1213 = vmatpush.msra.mxu3 %v1212_v28  ;;  %v2467_v45 = vsub.f32 %v79_v19, %v2443_v30  ;;  %v1241_v28 = vsub.f32 %v2425_v34, %v1240_v9  ;;  %v1252_v56 = vand.u32 4294901760, %v2454_v13  ;;  %v1247_v19 = vsub.f32 %v2438_v42, %v1246_v24 }
  0xa7   :  { %1068 = vmatpush.msra.mxu0 %v2722_v18  ;;  %1148 = vmatpush.msra.mxu2 %v2363_v59  ;;  %v2735_v18 = vld [vmem:[#allocation17_spill] sm:$0xff] }
  0xa8   :  { %1107 = vmatpush.msra.mxu1 %v2141_v22  ;;  %1219 = vmatpush.msra.mxu3 %v1218_v38  ;;  %v1236_v22 = vand.u32 4294901760, %v1235_v12  ;;  %v2482_v38 = vsub.f32 %v77_v2, %v2461_v49  ;;  %v1242_v47 = vand.u32 4294901760, %v1241_v28  ;;  %v1253_v2 = vsub.f32 %v2454_v13, %v1252_v56 }
  0xa9   :  { %1072 = vmatpush.msra.mxu0 %v2723_v14  ;;  %1150 = vmatpush.msra.mxu2 %v2376_v52  ;;  %v1248_v35 = vand.u32 4294901760, %v1247_v19 }
  0xaa   :  { %1109 = vmatpush.msra.mxu1 %v2154_v53  ;;  %1225 = vmatpush.msra.mxu3 %v1224_v50  ;;  %v1258_v53 = vand.u32 4294901760, %v2467_v45  ;;  %v2726_v50 = vand.u32 4294901760, %v2268_v27  ;;  %v1254_v12 = vand.u32 4294901760, %v1253_v2 }
  0xab   :  { %1076 = vmatpush.msra.mxu0 %v2724_v61  ;;  %1152 = vmatpush.msra.mxu2 %v2388_v8 }
  0xac   :  { %1111 = vmatpush.msra.mxu1 %v2162_v25  ;;  %1231 = vmatpush.msra.mxu3 %v1230_v37  ;;  %v1264_v25 = vand.u32 4294901760, %v2482_v38  ;;  %v1259_v58 = vsub.f32 %v2467_v45, %v1258_v53  ;;  %v2737_v37 = vld [vmem:[#allocation14_spill] sm:$0xff] }
  0xad   :  { %1080 = vmatpush.msra.mxu0 %v2725_v7  ;;  %1154 = vmatpush.msra.mxu2 %v2401_v44 }
  0xae   :  { %1113 = vmatpush.msra.mxu1 %v2175_v15  ;;  %1237 = vmatpush.msra.mxu3 %v1236_v22  ;;  %v2727_v15 = vand.u32 4294901760, %v2283_v31  ;;  %v1260_v27 = vand.u32 4294901760, %v1259_v58  ;;  %v2728_v31 = vld [vmem:[#allocation13_spill] sm:$0xff] }
  0xaf   :  { %1084 = vmatpush.msra.mxu0 %v2726_v50  ;;  %1156 = vmatpush.msra.mxu2 %v2414_v29 }
  0xb0   :  { %1115 = vmatpush.msra.mxu1 %v2195_v63  ;;  %1243 = vmatpush.msra.mxu3 %v1242_v47  ;;  %v1265_v63 = vsub.f32 %v2482_v38, %v1264_v25 }
  0xb1   :  { %1088 = vmatpush.msra.mxu0 %v2727_v15  ;;  %1158 = vmatpush.msra.mxu2 %v2430_v60 }
  0xb2   :  { %1117 = vmatpush.msra.mxu1 %v2207_v33  ;;  %1249 = vmatpush.msra.mxu3 %v1248_v35  ;;  %v1266_v33 = vand.u32 4294901760, %v1265_v63 }
  0xb3   :  { %827 = vmatmul.f32.vlgmr.msrb.gmra.mxu0 %v1994_v26  ;;  %1160 = vmatpush.msra.mxu2 %v2443_v30  ;;  %v2729_v26 = vand.u32 4294901760, %v2275_v1 }
  0xb4   :  { %1119 = vmatpush.msra.mxu1 %v2217_v54  ;;  %1275 = vmatpush.msrb.mxu0 %v2275_v1  ;;  %v2730_v54 = vld [vmem:[#allocation12_spill] sm:$0xff]  ;;  %v2733_v1 = vand.u32 4294901760, %v2310_v40 }
  0xb5   :  { %1255 = vmatpush.msra.mxu3 %v1254_v12  ;;  %982 = vmatmul.f32.vlgmr.msrb.gmra.mxu2 %v1932_v0  ;;  %v2731_v0 = vand.u32 4294901760, %v2297_v43 }
  0xb6   :  { %1278 = vmatpush.msrb.mxu0 %v2297_v43  ;;  %1121 = vmatpush.msra.mxu1 %v2229_v16  ;;  %v2732_v16 = vld [vmem:[#allocation11_spill] sm:$0xff]  ;;  %v2736_v43 = vand.u32 4294901760, %v2315_v21 }
  0xb7   :  { %1162 = vmatpush.msra.mxu2 %v2461_v49  ;;  %1261 = vmatpush.msra.mxu3 %v1260_v27 }
  0xb8   :  { %1021 = vmatmul.f32.vlgmr.msrb.gmra.mxu3 %v2728_v31  ;;  %1281 = vmatpush.msrb.mxu0 %v2310_v40  ;;  %v2738_v40 = vand.u32 4294901760, %v2330_v39 }
  0xb9   :  { %1369 = vmatpush.msrb.mxu2 %v2729_v26  ;;  %1123 = vmatpush.msra.mxu1 %v2240_v3  ;;  %v2734_v3 = vld [vmem:[#allocation18_spill] sm:$0xff] }
  0xba   :  { %1267 = vmatpush.msra.mxu3 %v1266_v33  ;;  %928 = vmatmul.f32.vlgmr.msrb.gmra.mxu1 %v2730_v54 }
  0xbb   :  { %1284 = vmatpush.msrb.mxu0 %v2315_v21  ;;  %1373 = vmatpush.msrb.mxu2 %v2731_v0  ;;  %v2739_v21 = vand.u32 4294901760, %v2348_v41 }
  0xbc   :  { %1436 = vmatpush.msrb.mxu3 %v2251_v46  ;;  %1125 = vmatpush.msra.mxu1 %v2732_v16 }
  0xbd   :  { %1287 = vmatpush.msrb.mxu0 %v2330_v39  ;;  %1377 = vmatpush.msrb.mxu2 %v2733_v1 }
  0xbe   :  { %1328 = vmatpush.msrb.mxu1 %v2251_v46  ;;  %1438 = vmatpush.msrb.mxu3 %v2734_v3 }
  0xbf   :  { %1168 = vmatmul.f32.vlgmr.msra.gmra.mxu2 %v2735_v18  ;;  %1290 = vmatpush.msrb.mxu0 %v2348_v41 }
  0xc0   :  { %1330 = vmatpush.msrb.mxu1 %v2734_v3  ;;  %1381 = vmatpush.msrb.mxu2 %v2736_v43 }
  0xc1   :  { %1440 = vmatpush.msrb.mxu3 %v2285_v62  ;;  %1090 = vmatmul.f32.vlgmr.msra.gmra.mxu0 %v2730_v54 }
  0xc2   :  { %1269 = vmatmul.f32.vlgmr.msra.gmra.mxu3 %v2737_v37  ;;  %1293 = vmatpush.msrb.mxu0 %v2361_v32 }
  0xc3   :  { %1332 = vmatpush.msrb.mxu1 %v2285_v62  ;;  %1385 = vmatpush.msrb.mxu2 %v2738_v40  ;;  %v2740_v62 = vand.u32 4294901760, %v2361_v32  ;;  %v2741_v32 = vld [vmem:[#allocation15_spill] sm:$0xff] }
  0xc4   :  { %1442 = vmatpush.msrb.mxu3 %v2289_v17  ;;  %1127 = vmatmul.f32.vlgmr.msra.gmra.mxu1 %v2730_v54 }
  0xc5   :  { %1296 = vmatpush.msrb.mxu0 %v2374_v6  ;;  %1334 = vmatpush.msrb.mxu1 %v2289_v17 }
  0xc6   :  { %1389 = vmatpush.msrb.mxu2 %v2739_v21  ;;  %1444 = vmatpush.msrb.mxu3 %v2302_v20 }
  0xc7   :  { %1299 = vmatpush.msrb.mxu0 %v2386_v57  ;;  %1336 = vmatpush.msrb.mxu1 %v2302_v20 }
  0xc8   :  { %1393 = vmatpush.msrb.mxu2 %v2740_v62  ;;  %1446 = vmatpush.msrb.mxu3 %v2322_v51 }
  0xc9   :  { %1302 = vmatpush.msrb.mxu0 %v2399_v10  ;;  %1338 = vmatpush.msrb.mxu1 %v2322_v51 }
  0xca   :  { %1397 = vmatpush.msrb.mxu2 %v1216_v23  ;;  %1448 = vmatpush.msrb.mxu3 %v2337_v4 }
  0xcb   :  { %1305 = vmatpush.msrb.mxu0 %v2412_v5  ;;  %1340 = vmatpush.msrb.mxu1 %v2337_v4  ;;  %v146_v4 = vpop.f32.mrf.mxu0 }
  0xcc   :  { %1401 = vmatpush.msrb.mxu2 %v1222_v48  ;;  %1450 = vmatpush.msrb.mxu3 %v2350_v11 }
  0xcd   :  { %1308 = vmatpush.msrb.mxu0 %v2425_v34  ;;  %1342 = vmatpush.msrb.mxu1 %v2350_v11  ;;  %v2742_v11 = vld [vmem:[#allocation16_spill] sm:$0xff] }
  0xce   :  { %1405 = vmatpush.msrb.mxu2 %v1228_v55  ;;  %1452 = vmatpush.msrb.mxu3 %v2363_v59 }
  0xcf   :  { %1311 = vmatpush.msrb.mxu0 %v2438_v42  ;;  %1344 = vmatpush.msrb.mxu1 %v2363_v59 }
  0xd0   :  { %1409 = vmatpush.msrb.mxu2 %v1234_v36  ;;  %1454 = vmatpush.msrb.mxu3 %v2376_v52 }
  0xd1   :  { %1314 = vmatpush.msrb.mxu0 %v2454_v13  ;;  %1346 = vmatpush.msrb.mxu1 %v2376_v52  ;;  %v247_v59 = vpop.f32.mrf.mxu1 }
  0xd2   :  { %1413 = vmatpush.msrb.mxu2 %v1240_v9  ;;  %1456 = vmatpush.msrb.mxu3 %v2388_v8  ;;  %v248_v41 = vadd.f32 %v247_v59, %v146_v4 }
  0xd3   :  { %1317 = vmatpush.msrb.mxu0 %v2467_v45  ;;  %1348 = vmatpush.msrb.mxu1 %v2388_v8  ;;  %v301_v20 = vpop.f32.mrf.mxu2  ;;  %v340_v8 = vpop.f32.mrf.mxu3 }
  0xd4   :  { %1417 = vmatpush.msrb.mxu2 %v1246_v24  ;;  %1458 = vmatpush.msrb.mxu3 %v2401_v44  ;;  %v302_v46 = vadd.f32 %v301_v20, %v248_v41 }
  0xd5   :  { %1320 = vmatpush.msrb.mxu0 %v2482_v38  ;;  %1350 = vmatpush.msrb.mxu1 %v2401_v44 }
  0xd6   :  { %1421 = vmatpush.msrb.mxu2 %v1252_v56  ;;  %1460 = vmatpush.msrb.mxu3 %v2414_v29  ;;  %v341_v17 = vadd.f32 %v340_v8, %v302_v46 }
  0xd7   :  { %1323 = vmatmul.f32.vlgmr.msrb.gmra.mxu0 %v2741_v32  ;;  %1352 = vmatpush.msrb.mxu1 %v2414_v29 }
  0xd8   :  { %1425 = vmatpush.msrb.mxu2 %v1258_v53  ;;  %1462 = vmatpush.msrb.mxu3 %v2430_v60  ;;  %v409_v51 = vpop.f32.mrf.mxu0 }
  0xd9   :  { %1354 = vmatpush.msrb.mxu1 %v2430_v60  ;;  %v410_v39 = vadd.f32 %v409_v51, %v341_v17 }
  0xda   :  { %1429 = vmatpush.msrb.mxu2 %v1264_v25  ;;  %1464 = vmatpush.msrb.mxu3 %v2443_v30 }
  0xdb   :  { %1431 = vmatmul.f32.vlgmr.msrb.gmra.mxu2 %v2737_v37  ;;  %1356 = vmatpush.msrb.mxu1 %v2443_v30  ;;  %v446_v52 = vpop.f32.mrf.mxu1 }
  0xdc   :  { %1466 = vmatpush.msrb.mxu3 %v2461_v49  ;;  %v447_v6 = vadd.f32 %v446_v52, %v410_v39  ;;  %v487_v57 = vpop.f32.mrf.mxu2 }
  0xdd   :  { %1468 = vmatmul.f32.vlgmr.msrb.gmra.mxu3 %v2737_v37  ;;  %1358 = vmatpush.msrb.mxu1 %v2461_v49 }
  0xde   :  { %1362 = vmatmul.f32.vlgmr.msrb.gmra.mxu1 %v2742_v11  ;;  %v488_v23 = vadd.f32 %v487_v57, %v447_v6 }
  0xdf   :  { %v588_v10 = vpop.f32.mrf.mxu3 }
  0xe0   :  { %v589_v48 = vadd.f32 %v588_v10, %v488_v23 }
  0xee   :  { %v642_v44 = vpop.f32.mrf.mxu0 }
  0xef   :  { %v643_v5 = vadd.f32 %v642_v44, %v589_v48 }
  0xf8   :  { %v681_v29 = vpop.f32.mrf.mxu1  ;;  %v750_v55 = vpop.f32.mrf.mxu2 }
  0xf9   :  { %v682_v34 = vadd.f32 %v681_v29, %v643_v5 }
  0xfb   :  { %v751_v60 = vadd.f32 %v750_v55, %v682_v34  ;;  %v787_v36 = vpop.f32.mrf.mxu3 }
  0xfd   :  { %v788_v42 = vadd.f32 %v787_v36, %v751_v60 }
  0xff   :  { %1472 = vst [vmem:[#allocation7] sm:$0xff] %v788_v42 }
 0x130   :  { %v828_v9 = vpop.f32.mrf.mxu0 }
 0x137   :  { %v929_v30 = vpop.f32.mrf.mxu1 }
 0x138   :  { %v930_v13 = vadd.f32 %v929_v30, %v828_v9  ;;  %v983_v24 = vpop.f32.mrf.mxu2 }
 0x13a   :  { %v984_v49 = vadd.f32 %v983_v24, %v930_v13 }
 0x13b   :  { %v1022_v45 = vpop.f32.mrf.mxu3 }
 0x13c   :  { %v1023_v28 = vadd.f32 %v1022_v45, %v984_v49 }
 0x13e   :  { %v1091_v14 = vpop.f32.mrf.mxu0 }
 0x13f   :  { %v1092_v56 = vadd.f32 %v1091_v14, %v1023_v28 }
 0x141   :  { %v1128_v22 = vpop.f32.mrf.mxu1 }
 0x142   :  { %v1129_v19 = vadd.f32 %v1128_v22, %v1092_v56  ;;  %v1169_v38 = vpop.f32.mrf.mxu2 }
 0x144   :  { %v1170_v61 = vadd.f32 %v1169_v38, %v1129_v19 }
 0x145   :  { %v1270_v53 = vpop.f32.mrf.mxu3 }
 0x146   :  { %v1271_v7 = vadd.f32 %v1270_v53, %v1170_v61 }
 0x154   :  { %v1324_v47 = vpop.f32.mrf.mxu0 }
 0x155   :  { %v1325_v2 = vadd.f32 %v1324_v47, %v1271_v7 }
 0x15b   :  { %v1363_v35 = vpop.f32.mrf.mxu1 }
 0x15c   :  { %v1364_v25 = vadd.f32 %v1363_v35, %v1325_v2 }
 0x15e   :  { %v1432_v50 = vpop.f32.mrf.mxu2 }
 0x15f   :  { %v1433_v58 = vadd.f32 %v1432_v50, %v1364_v25 }
 0x160   :  { %v1469_v15 = vpop.f32.mrf.mxu3 }
 0x161   :  { %v1470_v12 = vadd.f32 %v1469_v15, %v1433_v58 }
 0x163   :  { %1473 = vst [vmem:[#allocation7 + $0x8] sm:$0xff] %v1470_v12 }
 0x164   :  { %1484 = dma.vmem_to_hbm [thread:$0]  %s1480_s1, 256, %s1482_s23, [#allocation4]  }
 0x165   :  { %1573 = dma.done.wait [#allocation4], 256  }
 0x166   :  { %1574 = vsyncadd [#allocation4], 4294967040 }
 0x167   :  { %1489 = vsyncpa [#allocation3], 1 }
 0x168   :  { %1490 = vsyncpa [#allocation6], 1 }
 0x169   :  { %1491 = vsyncpa [#allocation4], 1 }

</bundles_post_ra>
